<compile_context>
chip_gen: v6e
topology: v6e:2x2x1
jax: 0.10.0
libtpu: 0.0.40
codegen_flags: <defaults>
</compile_context>

<pallas_src>
import functools

import jax
import jax.numpy as jnp
from jax import lax
from jax.experimental import pallas as pl
from jax.experimental.pallas import tpu as pltpu  # noqa: F401  (TPU backend)


def _resampler_kernel(q_in_ref, g_ref,
                      w_q_ref, w_kv_ref, w_o_ref,
                      b_q_ref, b_kv_ref, b_o_ref,
                      out_ref, *, num_heads, num_layers):
    """Entire PerceiverResampler forward in one kernel invocation (no grid)."""
    Q, E = q_in_ref.shape
    hd = E // num_heads
    g = g_ref[...]                                    # (M, D) graph features

    def layer_body(l, x):
        w_q = w_q_ref[l]                              # (E, E)  1/sqrt(hd) folded in
        w_kv = w_kv_ref[l]                            # (D, 2E) = [Wk^T | Wv^T]
        w_o = w_o_ref[l]                              # (E, E)
        b_q = b_q_ref[l]                              # (1, E)  scale folded in
        b_kv = b_kv_ref[l]                            # (1, 2E)
        b_o = b_o_ref[l]                              # (1, E)

        # Input projections (PyTorch: x @ W^T + b; weights pre-transposed).
        q = jnp.dot(x, w_q, preferred_element_type=jnp.float32) + b_q      # (Q, E)
        kv = jnp.dot(g, w_kv, preferred_element_type=jnp.float32) + b_kv   # (M, 2E)
        k = kv[:, :E]                                 # (M, E)
        v = kv[:, E:]                                 # (M, E)

        # Accumulate each head straight through the output projection:
        # new_x = b_o + sum_h softmax(q_h k_h^T) v_h @ Wo[h*hd:(h+1)*hd, :].
        new_x = jnp.broadcast_to(b_o, (Q, E)).astype(jnp.float32)
        for h in range(num_heads):                    # static unroll over heads
            lo, hi = h * hd, (h + 1) * hd
            s = lax.dot_general(q[:, lo:hi], k[:, lo:hi],
                                (((1,), (1,)), ((), ())),
                                preferred_element_type=jnp.float32)          # (Q, M)
            s = s - jnp.max(s, axis=-1, keepdims=True)
            p = jnp.exp(s)
            inv = pl.reciprocal(jnp.sum(p, axis=-1, keepdims=True), approx=True)
            pv = jnp.dot(p, v[:, lo:hi],
                         preferred_element_type=jnp.float32) * inv          # (Q, hd)
            new_x = new_x + jnp.dot(pv, w_o[lo:hi, :],
                                    preferred_element_type=jnp.float32)
        return new_x

    x0 = q_in_ref[...].astype(jnp.float32)
    x = lax.fori_loop(0, num_layers, layer_body, x0, unroll=True)
    out_ref[...] = x.astype(out_ref.dtype)


def pack_params(params, *, num_heads):
    """One-time parameter transform into the kernel layout.

    Folds the 1/sqrt(head_dim) scale into Wq/bq and fuses the K/V projection
    weights (and biases) along the lane axis.
    """
    E = params["wqT"].shape[-1]
    hd = E // num_heads
    scale = 1.0 / (hd ** 0.5)
    return {
        "w_q": (params["wqT"] * scale).astype(jnp.float32),                      # (L, E, E)
        "w_kv": jnp.concatenate([params["wkT"], params["wvT"]],
                                axis=-1).astype(jnp.float32),                    # (L, D, 2E)
        "w_o": params["woT"].astype(jnp.float32),                                # (L, E, E)
        "b_q": (params["bq"] * scale).astype(jnp.float32),                       # (L, 1, E)
        "b_kv": jnp.concatenate([params["bk"], params["bv"]],
                                axis=-1).astype(jnp.float32),                    # (L, 1, 2E)
        "b_o": params["bo"].astype(jnp.float32),                                 # (L, 1, E)
    }


def perceiver_resampler(graph_embedding, queries, packed, *, num_heads):
    """Runs the full stack of PerceiverResamplerLayers in one pallas_call.

    graph_embedding: (M, D) float32
    queries:         (1, Q, E) float32 (batch_first; batch must be 1 to match
                     graph_embedding.unsqueeze(0))
    packed:          output of pack_params(...)
    """
    assert queries.shape[0] == 1, "features have batch 1; queries batch must be 1"
    q2d = queries[0].astype(jnp.float32)
    g2d = graph_embedding.astype(jnp.float32)   # .to(queries.dtype)
    Q, E = q2d.shape
    L = packed["w_q"].shape[0]

    out = pl.pallas_call(
        functools.partial(_resampler_kernel, num_heads=num_heads, num_layers=L),
        out_shape=jax.ShapeDtypeStruct((Q, E), jnp.float32),
        # No grid, no BlockSpecs: every operand is small and is placed whole in
        # VMEM; the layer loop lives inside the kernel.
    )(q2d, g2d,
      packed["w_q"], packed["w_kv"], packed["w_o"],
      packed["b_q"], packed["b_kv"], packed["b_o"])
    return out[None]   # restore batch dim -> (1, Q, E)


def _reference(graph_embedding, queries, params, *, num_heads):
    """Pure-JAX reference matching nn.MultiheadAttention semantics."""
    x = queries[0].astype(jnp.float32)
    g = graph_embedding.astype(jnp.float32)
    L = params["wqT"].shape[0]
    E = x.shape[-1]
    hd = E // num_heads
    scale = 1.0 / (hd ** 0.5)
    for l in range(L):
        q = x @ params["wqT"][l] + params["bq"][l]
        k = g @ params["wkT"][l] + params["bk"][l]
        v = g @ params["wvT"][l] + params["bv"][l]
        outs = []
        for h in range(num_heads):
            qh = q[:, h * hd:(h + 1) * hd] * scale
            kh = k[:, h * hd:(h + 1) * hd]
            vh = v[:, h * hd:(h + 1) * hd]
            p = jax.nn.softmax(qh @ kh.T, axis=-1)
            outs.append(p @ vh)
        x = jnp.concatenate(outs, axis=-1) @ params["woT"][l] + params["bo"][l]
    return x[None]


def _init_params(key, num_layers, E, D):
    """Deterministic synthetic weights (shapes match nn.MultiheadAttention with
    embed_dim=E, kdim=vdim=D, bias=True).  Stored pre-transposed."""
    ks = jax.random.split(key, 10)
    std = 0.05
    return {
        "wqT": std * jax.random.normal(ks[0], (num_layers, E, E), jnp.float32),
        "wkT": std * jax.random.normal(ks[1], (num_layers, D, E), jnp.float32),
        "wvT": std * jax.random.normal(ks[2], (num_layers, D, E), jnp.float32),
        "woT": std * jax.random.normal(ks[3], (num_layers, E, E), jnp.float32),
        "bq": std * jax.random.normal(ks[4], (num_layers, 1, E), jnp.float32),
        "bk": std * jax.random.normal(ks[5], (num_layers, 1, E), jnp.float32),
        "bv": std * jax.random.normal(ks[6], (num_layers, 1, E), jnp.float32),
        "bo": std * jax.random.normal(ks[7], (num_layers, 1, E), jnp.float32),
    }


if __name__ == "__main__":
    # args: lm_hidden_size=32, graph_embedding_dim=16, num_heads=4,
    #       adapter_num_layers=2
    E, D, H, L = 32, 16, 4, 2
    Q, M = 8, 16     # number of learned queries, number of graph tokens

    key = jax.random.PRNGKey(0)
    k_g, k_q, k_p = jax.random.split(key, 3)
    graph_embedding = jax.random.normal(k_g, (M, D), jnp.float32)
    queries = jax.random.normal(k_q, (1, Q, E), jnp.float32)
    params = _init_params(k_p, L, E, D)
    packed = pack_params(params, num_heads=H)   # one-time parameter transform

    out = perceiver_resampler(graph_embedding, queries, packed, num_heads=H)
    out = jax.block_until_ready(out)

    ref = _reference(graph_embedding, queries, params, num_heads=H)
    assert out.shape == (1, Q, E)
    assert jnp.allclose(out, ref, atol=5e-2, rtol=5e-2), "mismatch vs reference"

    print("KERNEL_OK")
</pallas_src>

<mosaic_0001>
module attributes {stable_mosaic.version = 11 : i64} {
  func.func @_resampler_kernel(%arg0: memref<8x32xf32, #tpu.memory_space<vmem>>, %arg1: memref<16x16xf32, #tpu.memory_space<vmem>>, %arg2: memref<2x32x32xf32, #tpu.memory_space<vmem>>, %arg3: memref<2x16x64xf32, #tpu.memory_space<vmem>>, %arg4: memref<2x32x32xf32, #tpu.memory_space<vmem>>, %arg5: memref<2x1x32xf32, #tpu.memory_space<vmem>>, %arg6: memref<2x1x64xf32, #tpu.memory_space<vmem>>, %arg7: memref<2x1x32xf32, #tpu.memory_space<vmem>>, %arg8: memref<8x32xf32, #tpu.memory_space<vmem>>) attributes {dimension_semantics = [], scalar_prefetch = 0 : i64, scratch_operands = 0 : i64, tpu.core_type = #tpu.core_type<tc>} {
    %c0 = arith.constant 0 : index
    %c0_0 = arith.constant 0 : index
    %0 = vector.load %arg1[%c0, %c0_0] : memref<16x16xf32, #tpu.memory_space<vmem>>, vector<16x16xf32>
    %c0_1 = arith.constant 0 : index
    %c0_2 = arith.constant 0 : index
    %1 = vector.load %arg0[%c0_1, %c0_2] : memref<8x32xf32, #tpu.memory_space<vmem>>, vector<8x32xf32>
    %c0_i32 = arith.constant 0 : i32
    %2 = arith.index_cast %c0_i32 : i32 to index
    %c0_3 = arith.constant 0 : index
    %c0_4 = arith.constant 0 : index
    %3 = vector.load %arg2[%2, %c0_3, %c0_4] : memref<2x32x32xf32, #tpu.memory_space<vmem>>, vector<1x32x32xf32>
    %4 = vector.shape_cast %3 : vector<1x32x32xf32> to vector<32x32xf32>
    %5 = arith.index_cast %c0_i32 : i32 to index
    %c0_5 = arith.constant 0 : index
    %c0_6 = arith.constant 0 : index
    %6 = vector.load %arg3[%5, %c0_5, %c0_6] : memref<2x16x64xf32, #tpu.memory_space<vmem>>, vector<1x16x64xf32>
    %7 = vector.shape_cast %6 : vector<1x16x64xf32> to vector<16x64xf32>
    %8 = arith.index_cast %c0_i32 : i32 to index
    %c0_7 = arith.constant 0 : index
    %c0_8 = arith.constant 0 : index
    %9 = vector.load %arg4[%8, %c0_7, %c0_8] : memref<2x32x32xf32, #tpu.memory_space<vmem>>, vector<1x32x32xf32>
    %10 = vector.shape_cast %9 : vector<1x32x32xf32> to vector<32x32xf32>
    %11 = arith.index_cast %c0_i32 : i32 to index
    %c0_9 = arith.constant 0 : index
    %c0_10 = arith.constant 0 : index
    %12 = vector.load %arg5[%11, %c0_9, %c0_10] : memref<2x1x32xf32, #tpu.memory_space<vmem>>, vector<1x1x32xf32>
    %13 = vector.shape_cast %12 : vector<1x1x32xf32> to vector<1x32xf32>
    %14 = arith.index_cast %c0_i32 : i32 to index
    %c0_11 = arith.constant 0 : index
    %c0_12 = arith.constant 0 : index
    %15 = vector.load %arg6[%14, %c0_11, %c0_12] : memref<2x1x64xf32, #tpu.memory_space<vmem>>, vector<1x1x64xf32>
    %16 = vector.shape_cast %15 : vector<1x1x64xf32> to vector<1x64xf32>
    %17 = arith.index_cast %c0_i32 : i32 to index
    %c0_13 = arith.constant 0 : index
    %c0_14 = arith.constant 0 : index
    %18 = vector.load %arg7[%17, %c0_13, %c0_14] : memref<2x1x32xf32, #tpu.memory_space<vmem>>, vector<1x1x32xf32>
    %19 = vector.shape_cast %18 : vector<1x1x32xf32> to vector<1x32xf32>
    %cst = arith.constant dense<0.000000e+00> : vector<8x32xf32>
    %20 = tpu.matmul %1, %4, %cst {dimension_numbers = #tpu.dot_dimension_numbers<[1], [0], [0], [1], [0, 0, 1, 1], [], []>} : vector<8x32xf32>, vector<32x32xf32>, vector<8x32xf32> -> vector<8x32xf32>
    %21 = vector.broadcast %13 : vector<1x32xf32> to vector<8x32xf32>
    %22 = arith.addf %20, %21 : vector<8x32xf32>
    %cst_15 = arith.constant dense<0.000000e+00> : vector<16x64xf32>
    %23 = tpu.matmul %0, %7, %cst_15 {dimension_numbers = #tpu.dot_dimension_numbers<[1], [0], [0], [1], [0, 0, 1, 1], [], []>} : vector<16x16xf32>, vector<16x64xf32>, vector<16x64xf32> -> vector<16x64xf32>
    %24 = vector.broadcast %16 : vector<1x64xf32> to vector<16x64xf32>
    %25 = arith.addf %23, %24 : vector<16x64xf32>
    %26 = vector.extract_strided_slice %25 {offsets = [0, 0], sizes = [16, 32], strides = [1, 1]} : vector<16x64xf32> to vector<16x32xf32>
    %27 = vector.extract_strided_slice %25 {offsets = [0, 32], sizes = [16, 32], strides = [1, 1]} : vector<16x64xf32> to vector<16x32xf32>
    %28 = vector.shape_cast %19 : vector<1x32xf32> to vector<1x32xf32>
    %29 = vector.broadcast %28 : vector<1x32xf32> to vector<8x32xf32>
    %30 = vector.extract_strided_slice %22 {offsets = [0, 0], sizes = [8, 8], strides = [1, 1]} : vector<8x32xf32> to vector<8x8xf32>
    %31 = vector.extract_strided_slice %26 {offsets = [0, 0], sizes = [16, 8], strides = [1, 1]} : vector<16x32xf32> to vector<16x8xf32>
    %cst_16 = arith.constant dense<0.000000e+00> : vector<8x16xf32>
    %32 = tpu.matmul %30, %31, %cst_16 {dimension_numbers = #tpu.dot_dimension_numbers<[1], [1], [0], [0], [0, 0, 1, 0], [], []>} : vector<8x8xf32>, vector<16x8xf32>, vector<8x16xf32> -> vector<8x16xf32>
    %cst_17 = arith.constant dense<0xFF800000> : vector<8xf32>
    %33 = vector.multi_reduction <maximumf>, %32, %cst_17 [1] : vector<8x16xf32> to vector<8xf32>
    %34 = vector.shape_cast %33 : vector<8xf32> to vector<8x1xf32>
    %35 = vector.broadcast %34 : vector<8x1xf32> to vector<8x16xf32>
    %36 = arith.subf %32, %35 : vector<8x16xf32>
    %37 = math.exp %36 : vector<8x16xf32>
    %cst_18 = arith.constant dense<0.000000e+00> : vector<8xf32>
    %38 = vector.multi_reduction <add>, %37, %cst_18 [1] : vector<8x16xf32> to vector<8xf32>
    %39 = vector.shape_cast %38 : vector<8xf32> to vector<8x1xf32>
    %40 = tpu.reciprocal %39 {approx = true} : vector<8x1xf32> -> vector<8x1xf32>
    %41 = vector.extract_strided_slice %27 {offsets = [0, 0], sizes = [16, 8], strides = [1, 1]} : vector<16x32xf32> to vector<16x8xf32>
    %cst_19 = arith.constant dense<0.000000e+00> : vector<8x8xf32>
    %42 = tpu.matmul %37, %41, %cst_19 {dimension_numbers = #tpu.dot_dimension_numbers<[1], [0], [0], [1], [0, 0, 1, 1], [], []>} : vector<8x16xf32>, vector<16x8xf32>, vector<8x8xf32> -> vector<8x8xf32>
    %43 = vector.broadcast %40 : vector<8x1xf32> to vector<8x8xf32>
    %44 = arith.mulf %42, %43 : vector<8x8xf32>
    %45 = vector.extract_strided_slice %10 {offsets = [0, 0], sizes = [8, 32], strides = [1, 1]} : vector<32x32xf32> to vector<8x32xf32>
    %cst_20 = arith.constant dense<0.000000e+00> : vector<8x32xf32>
    %46 = tpu.matmul %44, %45, %cst_20 {dimension_numbers = #tpu.dot_dimension_numbers<[1], [0], [0], [1], [0, 0, 1, 1], [], []>} : vector<8x8xf32>, vector<8x32xf32>, vector<8x32xf32> -> vector<8x32xf32>
    %47 = arith.addf %29, %46 : vector<8x32xf32>
    %48 = vector.extract_strided_slice %22 {offsets = [0, 8], sizes = [8, 8], strides = [1, 1]} : vector<8x32xf32> to vector<8x8xf32>
    %49 = vector.extract_strided_slice %26 {offsets = [0, 8], sizes = [16, 8], strides = [1, 1]} : vector<16x32xf32> to vector<16x8xf32>
    %cst_21 = arith.constant dense<0.000000e+00> : vector<8x16xf32>
    %50 = tpu.matmul %48, %49, %cst_21 {dimension_numbers = #tpu.dot_dimension_numbers<[1], [1], [0], [0], [0, 0, 1, 0], [], []>} : vector<8x8xf32>, vector<16x8xf32>, vector<8x16xf32> -> vector<8x16xf32>
    %cst_22 = arith.constant dense<0xFF800000> : vector<8xf32>
    %51 = vector.multi_reduction <maximumf>, %50, %cst_22 [1] : vector<8x16xf32> to vector<8xf32>
    %52 = vector.shape_cast %51 : vector<8xf32> to vector<8x1xf32>
    %53 = vector.broadcast %52 : vector<8x1xf32> to vector<8x16xf32>
    %54 = arith.subf %50, %53 : vector<8x16xf32>
    %55 = math.exp %54 : vector<8x16xf32>
    %cst_23 = arith.constant dense<0.000000e+00> : vector<8xf32>
    %56 = vector.multi_reduction <add>, %55, %cst_23 [1] : vector<8x16xf32> to vector<8xf32>
    %57 = vector.shape_cast %56 : vector<8xf32> to vector<8x1xf32>
    %58 = tpu.reciprocal %57 {approx = true} : vector<8x1xf32> -> vector<8x1xf32>
    %59 = vector.extract_strided_slice %27 {offsets = [0, 8], sizes = [16, 8], strides = [1, 1]} : vector<16x32xf32> to vector<16x8xf32>
    %cst_24 = arith.constant dense<0.000000e+00> : vector<8x8xf32>
    %60 = tpu.matmul %55, %59, %cst_24 {dimension_numbers = #tpu.dot_dimension_numbers<[1], [0], [0], [1], [0, 0, 1, 1], [], []>} : vector<8x16xf32>, vector<16x8xf32>, vector<8x8xf32> -> vector<8x8xf32>
    %61 = vector.broadcast %58 : vector<8x1xf32> to vector<8x8xf32>
    %62 = arith.mulf %60, %61 : vector<8x8xf32>
    %63 = vector.extract_strided_slice %10 {offsets = [8, 0], sizes = [8, 32], strides = [1, 1]} : vector<32x32xf32> to vector<8x32xf32>
    %cst_25 = arith.constant dense<0.000000e+00> : vector<8x32xf32>
    %64 = tpu.matmul %62, %63, %cst_25 {dimension_numbers = #tpu.dot_dimension_numbers<[1], [0], [0], [1], [0, 0, 1, 1], [], []>} : vector<8x8xf32>, vector<8x32xf32>, vector<8x32xf32> -> vector<8x32xf32>
    %65 = arith.addf %47, %64 : vector<8x32xf32>
    %66 = vector.extract_strided_slice %22 {offsets = [0, 16], sizes = [8, 8], strides = [1, 1]} : vector<8x32xf32> to vector<8x8xf32>
    %67 = vector.extract_strided_slice %26 {offsets = [0, 16], sizes = [16, 8], strides = [1, 1]} : vector<16x32xf32> to vector<16x8xf32>
    %cst_26 = arith.constant dense<0.000000e+00> : vector<8x16xf32>
    %68 = tpu.matmul %66, %67, %cst_26 {dimension_numbers = #tpu.dot_dimension_numbers<[1], [1], [0], [0], [0, 0, 1, 0], [], []>} : vector<8x8xf32>, vector<16x8xf32>, vector<8x16xf32> -> vector<8x16xf32>
    %cst_27 = arith.constant dense<0xFF800000> : vector<8xf32>
    %69 = vector.multi_reduction <maximumf>, %68, %cst_27 [1] : vector<8x16xf32> to vector<8xf32>
    %70 = vector.shape_cast %69 : vector<8xf32> to vector<8x1xf32>
    %71 = vector.broadcast %70 : vector<8x1xf32> to vector<8x16xf32>
    %72 = arith.subf %68, %71 : vector<8x16xf32>
    %73 = math.exp %72 : vector<8x16xf32>
    %cst_28 = arith.constant dense<0.000000e+00> : vector<8xf32>
    %74 = vector.multi_reduction <add>, %73, %cst_28 [1] : vector<8x16xf32> to vector<8xf32>
    %75 = vector.shape_cast %74 : vector<8xf32> to vector<8x1xf32>
    %76 = tpu.reciprocal %75 {approx = true} : vector<8x1xf32> -> vector<8x1xf32>
    %77 = vector.extract_strided_slice %27 {offsets = [0, 16], sizes = [16, 8], strides = [1, 1]} : vector<16x32xf32> to vector<16x8xf32>
    %cst_29 = arith.constant dense<0.000000e+00> : vector<8x8xf32>
    %78 = tpu.matmul %73, %77, %cst_29 {dimension_numbers = #tpu.dot_dimension_numbers<[1], [0], [0], [1], [0, 0, 1, 1], [], []>} : vector<8x16xf32>, vector<16x8xf32>, vector<8x8xf32> -> vector<8x8xf32>
    %79 = vector.broadcast %76 : vector<8x1xf32> to vector<8x8xf32>
    %80 = arith.mulf %78, %79 : vector<8x8xf32>
    %81 = vector.extract_strided_slice %10 {offsets = [16, 0], sizes = [8, 32], strides = [1, 1]} : vector<32x32xf32> to vector<8x32xf32>
    %cst_30 = arith.constant dense<0.000000e+00> : vector<8x32xf32>
    %82 = tpu.matmul %80, %81, %cst_30 {dimension_numbers = #tpu.dot_dimension_numbers<[1], [0], [0], [1], [0, 0, 1, 1], [], []>} : vector<8x8xf32>, vector<8x32xf32>, vector<8x32xf32> -> vector<8x32xf32>
    %83 = arith.addf %65, %82 : vector<8x32xf32>
    %84 = vector.extract_strided_slice %22 {offsets = [0, 24], sizes = [8, 8], strides = [1, 1]} : vector<8x32xf32> to vector<8x8xf32>
    %85 = vector.extract_strided_slice %26 {offsets = [0, 24], sizes = [16, 8], strides = [1, 1]} : vector<16x32xf32> to vector<16x8xf32>
    %cst_31 = arith.constant dense<0.000000e+00> : vector<8x16xf32>
    %86 = tpu.matmul %84, %85, %cst_31 {dimension_numbers = #tpu.dot_dimension_numbers<[1], [1], [0], [0], [0, 0, 1, 0], [], []>} : vector<8x8xf32>, vector<16x8xf32>, vector<8x16xf32> -> vector<8x16xf32>
    %cst_32 = arith.constant dense<0xFF800000> : vector<8xf32>
    %87 = vector.multi_reduction <maximumf>, %86, %cst_32 [1] : vector<8x16xf32> to vector<8xf32>
    %88 = vector.shape_cast %87 : vector<8xf32> to vector<8x1xf32>
    %89 = vector.broadcast %88 : vector<8x1xf32> to vector<8x16xf32>
    %90 = arith.subf %86, %89 : vector<8x16xf32>
    %91 = math.exp %90 : vector<8x16xf32>
    %cst_33 = arith.constant dense<0.000000e+00> : vector<8xf32>
    %92 = vector.multi_reduction <add>, %91, %cst_33 [1] : vector<8x16xf32> to vector<8xf32>
    %93 = vector.shape_cast %92 : vector<8xf32> to vector<8x1xf32>
    %94 = tpu.reciprocal %93 {approx = true} : vector<8x1xf32> -> vector<8x1xf32>
    %95 = vector.extract_strided_slice %27 {offsets = [0, 24], sizes = [16, 8], strides = [1, 1]} : vector<16x32xf32> to vector<16x8xf32>
    %cst_34 = arith.constant dense<0.000000e+00> : vector<8x8xf32>
    %96 = tpu.matmul %91, %95, %cst_34 {dimension_numbers = #tpu.dot_dimension_numbers<[1], [0], [0], [1], [0, 0, 1, 1], [], []>} : vector<8x16xf32>, vector<16x8xf32>, vector<8x8xf32> -> vector<8x8xf32>
    %97 = vector.broadcast %94 : vector<8x1xf32> to vector<8x8xf32>
    %98 = arith.mulf %96, %97 : vector<8x8xf32>
    %99 = vector.extract_strided_slice %10 {offsets = [24, 0], sizes = [8, 32], strides = [1, 1]} : vector<32x32xf32> to vector<8x32xf32>
    %cst_35 = arith.constant dense<0.000000e+00> : vector<8x32xf32>
    %100 = tpu.matmul %98, %99, %cst_35 {dimension_numbers = #tpu.dot_dimension_numbers<[1], [0], [0], [1], [0, 0, 1, 1], [], []>} : vector<8x8xf32>, vector<8x32xf32>, vector<8x32xf32> -> vector<8x32xf32>
    %101 = arith.addf %83, %100 : vector<8x32xf32>
    %c1_i32 = arith.constant 1 : i32
    %102 = arith.index_cast %c1_i32 : i32 to index
    %c0_36 = arith.constant 0 : index
    %c0_37 = arith.constant 0 : index
    %103 = vector.load %arg2[%102, %c0_36, %c0_37] : memref<2x32x32xf32, #tpu.memory_space<vmem>>, vector<1x32x32xf32>
    %104 = vector.shape_cast %103 : vector<1x32x32xf32> to vector<32x32xf32>
    %105 = arith.index_cast %c1_i32 : i32 to index
    %c0_38 = arith.constant 0 : index
    %c0_39 = arith.constant 0 : index
    %106 = vector.load %arg3[%105, %c0_38, %c0_39] : memref<2x16x64xf32, #tpu.memory_space<vmem>>, vector<1x16x64xf32>
    %107 = vector.shape_cast %106 : vector<1x16x64xf32> to vector<16x64xf32>
    %108 = arith.index_cast %c1_i32 : i32 to index
    %c0_40 = arith.constant 0 : index
    %c0_41 = arith.constant 0 : index
    %109 = vector.load %arg4[%108, %c0_40, %c0_41] : memref<2x32x32xf32, #tpu.memory_space<vmem>>, vector<1x32x32xf32>
    %110 = vector.shape_cast %109 : vector<1x32x32xf32> to vector<32x32xf32>
    %111 = arith.index_cast %c1_i32 : i32 to index
    %c0_42 = arith.constant 0 : index
    %c0_43 = arith.constant 0 : index
    %112 = vector.load %arg5[%111, %c0_42, %c0_43] : memref<2x1x32xf32, #tpu.memory_space<vmem>>, vector<1x1x32xf32>
    %113 = vector.shape_cast %112 : vector<1x1x32xf32> to vector<1x32xf32>
    %114 = arith.index_cast %c1_i32 : i32 to index
    %c0_44 = arith.constant 0 : index
    %c0_45 = arith.constant 0 : index
    %115 = vector.load %arg6[%114, %c0_44, %c0_45] : memref<2x1x64xf32, #tpu.memory_space<vmem>>, vector<1x1x64xf32>
    %116 = vector.shape_cast %115 : vector<1x1x64xf32> to vector<1x64xf32>
    %117 = arith.index_cast %c1_i32 : i32 to index
    %c0_46 = arith.constant 0 : index
    %c0_47 = arith.constant 0 : index
    %118 = vector.load %arg7[%117, %c0_46, %c0_47] : memref<2x1x32xf32, #tpu.memory_space<vmem>>, vector<1x1x32xf32>
    %119 = vector.shape_cast %118 : vector<1x1x32xf32> to vector<1x32xf32>
    %cst_48 = arith.constant dense<0.000000e+00> : vector<8x32xf32>
    %120 = tpu.matmul %101, %104, %cst_48 {dimension_numbers = #tpu.dot_dimension_numbers<[1], [0], [0], [1], [0, 0, 1, 1], [], []>} : vector<8x32xf32>, vector<32x32xf32>, vector<8x32xf32> -> vector<8x32xf32>
    %121 = vector.broadcast %113 : vector<1x32xf32> to vector<8x32xf32>
    %122 = arith.addf %120, %121 : vector<8x32xf32>
    %cst_49 = arith.constant dense<0.000000e+00> : vector<16x64xf32>
    %123 = tpu.matmul %0, %107, %cst_49 {dimension_numbers = #tpu.dot_dimension_numbers<[1], [0], [0], [1], [0, 0, 1, 1], [], []>} : vector<16x16xf32>, vector<16x64xf32>, vector<16x64xf32> -> vector<16x64xf32>
    %124 = vector.broadcast %116 : vector<1x64xf32> to vector<16x64xf32>
    %125 = arith.addf %123, %124 : vector<16x64xf32>
    %126 = vector.extract_strided_slice %125 {offsets = [0, 0], sizes = [16, 32], strides = [1, 1]} : vector<16x64xf32> to vector<16x32xf32>
    %127 = vector.extract_strided_slice %125 {offsets = [0, 32], sizes = [16, 32], strides = [1, 1]} : vector<16x64xf32> to vector<16x32xf32>
    %128 = vector.shape_cast %119 : vector<1x32xf32> to vector<1x32xf32>
    %129 = vector.broadcast %128 : vector<1x32xf32> to vector<8x32xf32>
    %130 = vector.extract_strided_slice %122 {offsets = [0, 0], sizes = [8, 8], strides = [1, 1]} : vector<8x32xf32> to vector<8x8xf32>
    %131 = vector.extract_strided_slice %126 {offsets = [0, 0], sizes = [16, 8], strides = [1, 1]} : vector<16x32xf32> to vector<16x8xf32>
    %cst_50 = arith.constant dense<0.000000e+00> : vector<8x16xf32>
    %132 = tpu.matmul %130, %131, %cst_50 {dimension_numbers = #tpu.dot_dimension_numbers<[1], [1], [0], [0], [0, 0, 1, 0], [], []>} : vector<8x8xf32>, vector<16x8xf32>, vector<8x16xf32> -> vector<8x16xf32>
    %cst_51 = arith.constant dense<0xFF800000> : vector<8xf32>
    %133 = vector.multi_reduction <maximumf>, %132, %cst_51 [1] : vector<8x16xf32> to vector<8xf32>
    %134 = vector.shape_cast %133 : vector<8xf32> to vector<8x1xf32>
    %135 = vector.broadcast %134 : vector<8x1xf32> to vector<8x16xf32>
    %136 = arith.subf %132, %135 : vector<8x16xf32>
    %137 = math.exp %136 : vector<8x16xf32>
    %cst_52 = arith.constant dense<0.000000e+00> : vector<8xf32>
    %138 = vector.multi_reduction <add>, %137, %cst_52 [1] : vector<8x16xf32> to vector<8xf32>
    %139 = vector.shape_cast %138 : vector<8xf32> to vector<8x1xf32>
    %140 = tpu.reciprocal %139 {approx = true} : vector<8x1xf32> -> vector<8x1xf32>
    %141 = vector.extract_strided_slice %127 {offsets = [0, 0], sizes = [16, 8], strides = [1, 1]} : vector<16x32xf32> to vector<16x8xf32>
    %cst_53 = arith.constant dense<0.000000e+00> : vector<8x8xf32>
    %142 = tpu.matmul %137, %141, %cst_53 {dimension_numbers = #tpu.dot_dimension_numbers<[1], [0], [0], [1], [0, 0, 1, 1], [], []>} : vector<8x16xf32>, vector<16x8xf32>, vector<8x8xf32> -> vector<8x8xf32>
    %143 = vector.broadcast %140 : vector<8x1xf32> to vector<8x8xf32>
    %144 = arith.mulf %142, %143 : vector<8x8xf32>
    %145 = vector.extract_strided_slice %110 {offsets = [0, 0], sizes = [8, 32], strides = [1, 1]} : vector<32x32xf32> to vector<8x32xf32>
    %cst_54 = arith.constant dense<0.000000e+00> : vector<8x32xf32>
    %146 = tpu.matmul %144, %145, %cst_54 {dimension_numbers = #tpu.dot_dimension_numbers<[1], [0], [0], [1], [0, 0, 1, 1], [], []>} : vector<8x8xf32>, vector<8x32xf32>, vector<8x32xf32> -> vector<8x32xf32>
    %147 = arith.addf %129, %146 : vector<8x32xf32>
    %148 = vector.extract_strided_slice %122 {offsets = [0, 8], sizes = [8, 8], strides = [1, 1]} : vector<8x32xf32> to vector<8x8xf32>
    %149 = vector.extract_strided_slice %126 {offsets = [0, 8], sizes = [16, 8], strides = [1, 1]} : vector<16x32xf32> to vector<16x8xf32>
    %cst_55 = arith.constant dense<0.000000e+00> : vector<8x16xf32>
    %150 = tpu.matmul %148, %149, %cst_55 {dimension_numbers = #tpu.dot_dimension_numbers<[1], [1], [0], [0], [0, 0, 1, 0], [], []>} : vector<8x8xf32>, vector<16x8xf32>, vector<8x16xf32> -> vector<8x16xf32>
    %cst_56 = arith.constant dense<0xFF800000> : vector<8xf32>
    %151 = vector.multi_reduction <maximumf>, %150, %cst_56 [1] : vector<8x16xf32> to vector<8xf32>
    %152 = vector.shape_cast %151 : vector<8xf32> to vector<8x1xf32>
    %153 = vector.broadcast %152 : vector<8x1xf32> to vector<8x16xf32>
    %154 = arith.subf %150, %153 : vector<8x16xf32>
    %155 = math.exp %154 : vector<8x16xf32>
    %cst_57 = arith.constant dense<0.000000e+00> : vector<8xf32>
    %156 = vector.multi_reduction <add>, %155, %cst_57 [1] : vector<8x16xf32> to vector<8xf32>
    %157 = vector.shape_cast %156 : vector<8xf32> to vector<8x1xf32>
    %158 = tpu.reciprocal %157 {approx = true} : vector<8x1xf32> -> vector<8x1xf32>
    %159 = vector.extract_strided_slice %127 {offsets = [0, 8], sizes = [16, 8], strides = [1, 1]} : vector<16x32xf32> to vector<16x8xf32>
    %cst_58 = arith.constant dense<0.000000e+00> : vector<8x8xf32>
    %160 = tpu.matmul %155, %159, %cst_58 {dimension_numbers = #tpu.dot_dimension_numbers<[1], [0], [0], [1], [0, 0, 1, 1], [], []>} : vector<8x16xf32>, vector<16x8xf32>, vector<8x8xf32> -> vector<8x8xf32>
    %161 = vector.broadcast %158 : vector<8x1xf32> to vector<8x8xf32>
    %162 = arith.mulf %160, %161 : vector<8x8xf32>
    %163 = vector.extract_strided_slice %110 {offsets = [8, 0], sizes = [8, 32], strides = [1, 1]} : vector<32x32xf32> to vector<8x32xf32>
    %cst_59 = arith.constant dense<0.000000e+00> : vector<8x32xf32>
    %164 = tpu.matmul %162, %163, %cst_59 {dimension_numbers = #tpu.dot_dimension_numbers<[1], [0], [0], [1], [0, 0, 1, 1], [], []>} : vector<8x8xf32>, vector<8x32xf32>, vector<8x32xf32> -> vector<8x32xf32>
    %165 = arith.addf %147, %164 : vector<8x32xf32>
    %166 = vector.extract_strided_slice %122 {offsets = [0, 16], sizes = [8, 8], strides = [1, 1]} : vector<8x32xf32> to vector<8x8xf32>
    %167 = vector.extract_strided_slice %126 {offsets = [0, 16], sizes = [16, 8], strides = [1, 1]} : vector<16x32xf32> to vector<16x8xf32>
    %cst_60 = arith.constant dense<0.000000e+00> : vector<8x16xf32>
    %168 = tpu.matmul %166, %167, %cst_60 {dimension_numbers = #tpu.dot_dimension_numbers<[1], [1], [0], [0], [0, 0, 1, 0], [], []>} : vector<8x8xf32>, vector<16x8xf32>, vector<8x16xf32> -> vector<8x16xf32>
    %cst_61 = arith.constant dense<0xFF800000> : vector<8xf32>
    %169 = vector.multi_reduction <maximumf>, %168, %cst_61 [1] : vector<8x16xf32> to vector<8xf32>
    %170 = vector.shape_cast %169 : vector<8xf32> to vector<8x1xf32>
    %171 = vector.broadcast %170 : vector<8x1xf32> to vector<8x16xf32>
    %172 = arith.subf %168, %171 : vector<8x16xf32>
    %173 = math.exp %172 : vector<8x16xf32>
    %cst_62 = arith.constant dense<0.000000e+00> : vector<8xf32>
    %174 = vector.multi_reduction <add>, %173, %cst_62 [1] : vector<8x16xf32> to vector<8xf32>
    %175 = vector.shape_cast %174 : vector<8xf32> to vector<8x1xf32>
    %176 = tpu.reciprocal %175 {approx = true} : vector<8x1xf32> -> vector<8x1xf32>
    %177 = vector.extract_strided_slice %127 {offsets = [0, 16], sizes = [16, 8], strides = [1, 1]} : vector<16x32xf32> to vector<16x8xf32>
    %cst_63 = arith.constant dense<0.000000e+00> : vector<8x8xf32>
    %178 = tpu.matmul %173, %177, %cst_63 {dimension_numbers = #tpu.dot_dimension_numbers<[1], [0], [0], [1], [0, 0, 1, 1], [], []>} : vector<8x16xf32>, vector<16x8xf32>, vector<8x8xf32> -> vector<8x8xf32>
    %179 = vector.broadcast %176 : vector<8x1xf32> to vector<8x8xf32>
    %180 = arith.mulf %178, %179 : vector<8x8xf32>
    %181 = vector.extract_strided_slice %110 {offsets = [16, 0], sizes = [8, 32], strides = [1, 1]} : vector<32x32xf32> to vector<8x32xf32>
    %cst_64 = arith.constant dense<0.000000e+00> : vector<8x32xf32>
    %182 = tpu.matmul %180, %181, %cst_64 {dimension_numbers = #tpu.dot_dimension_numbers<[1], [0], [0], [1], [0, 0, 1, 1], [], []>} : vector<8x8xf32>, vector<8x32xf32>, vector<8x32xf32> -> vector<8x32xf32>
    %183 = arith.addf %165, %182 : vector<8x32xf32>
    %184 = vector.extract_strided_slice %122 {offsets = [0, 24], sizes = [8, 8], strides = [1, 1]} : vector<8x32xf32> to vector<8x8xf32>
    %185 = vector.extract_strided_slice %126 {offsets = [0, 24], sizes = [16, 8], strides = [1, 1]} : vector<16x32xf32> to vector<16x8xf32>
    %cst_65 = arith.constant dense<0.000000e+00> : vector<8x16xf32>
    %186 = tpu.matmul %184, %185, %cst_65 {dimension_numbers = #tpu.dot_dimension_numbers<[1], [1], [0], [0], [0, 0, 1, 0], [], []>} : vector<8x8xf32>, vector<16x8xf32>, vector<8x16xf32> -> vector<8x16xf32>
    %cst_66 = arith.constant dense<0xFF800000> : vector<8xf32>
    %187 = vector.multi_reduction <maximumf>, %186, %cst_66 [1] : vector<8x16xf32> to vector<8xf32>
    %188 = vector.shape_cast %187 : vector<8xf32> to vector<8x1xf32>
    %189 = vector.broadcast %188 : vector<8x1xf32> to vector<8x16xf32>
    %190 = arith.subf %186, %189 : vector<8x16xf32>
    %191 = math.exp %190 : vector<8x16xf32>
    %cst_67 = arith.constant dense<0.000000e+00> : vector<8xf32>
    %192 = vector.multi_reduction <add>, %191, %cst_67 [1] : vector<8x16xf32> to vector<8xf32>
    %193 = vector.shape_cast %192 : vector<8xf32> to vector<8x1xf32>
    %194 = tpu.reciprocal %193 {approx = true} : vector<8x1xf32> -> vector<8x1xf32>
    %195 = vector.extract_strided_slice %127 {offsets = [0, 24], sizes = [16, 8], strides = [1, 1]} : vector<16x32xf32> to vector<16x8xf32>
    %cst_68 = arith.constant dense<0.000000e+00> : vector<8x8xf32>
    %196 = tpu.matmul %191, %195, %cst_68 {dimension_numbers = #tpu.dot_dimension_numbers<[1], [0], [0], [1], [0, 0, 1, 1], [], []>} : vector<8x16xf32>, vector<16x8xf32>, vector<8x8xf32> -> vector<8x8xf32>
    %197 = vector.broadcast %194 : vector<8x1xf32> to vector<8x8xf32>
    %198 = arith.mulf %196, %197 : vector<8x8xf32>
    %199 = vector.extract_strided_slice %110 {offsets = [24, 0], sizes = [8, 32], strides = [1, 1]} : vector<32x32xf32> to vector<8x32xf32>
    %cst_69 = arith.constant dense<0.000000e+00> : vector<8x32xf32>
    %200 = tpu.matmul %198, %199, %cst_69 {dimension_numbers = #tpu.dot_dimension_numbers<[1], [0], [0], [1], [0, 0, 1, 1], [], []>} : vector<8x8xf32>, vector<8x32xf32>, vector<8x32xf32> -> vector<8x32xf32>
    %201 = arith.addf %183, %200 : vector<8x32xf32>
    %c2_i32 = arith.constant 2 : i32
    %c0_70 = arith.constant 0 : index
    %c0_71 = arith.constant 0 : index
    %202 = vector.load %arg8[%c0_70, %c0_71] : memref<8x32xf32, #tpu.memory_space<vmem>>, vector<8x32xf32>
    tpu.vector_store %arg8[%c0_70, %c0_71], %201 {strides = array<i32>} : memref<8x32xf32, #tpu.memory_space<vmem>>, vector<8x32xf32>,
    return
  }
}

</mosaic_0001>

<bundles_post_ra>
// kernel: tpu_custom_call.1
= control target key start
LH: loop header
LB: loop body
LE: loop exit
PB: predicated region body
PF: predicated region fallthrough
CT: control target
= control target key end

     0   :  { %13 = vsyncpa [#allocation3], 0  ;;  %s3309_s0 = inlined_call_operand.hbm [shape: f32[8,32], index: 0, kind: input, shape index: {}]   ;;  %s3310_s1 = inlined_call_operand.hbm [shape: f32[16,16], index: 1, kind: input, shape index: {}]   ;;  %s3311_s2 = inlined_call_operand.hbm [shape: f32[2,32,32], index: 2, kind: input, shape index: {}]   ;;  %s3312_s3 = inlined_call_operand.hbm [shape: f32[2,16,64], index: 3, kind: input, shape index: {}]   ;;  %s3313_s4 = inlined_call_operand.hbm [shape: f32[2,32,32], index: 4, kind: input, shape index: {}]   ;;  %s3314_s5 = inlined_call_operand.vmem [shape: f32[2,1,32], index: 5, kind: input, shape index: {}]   ;;  %s3315_s6 = inlined_call_operand.vmem [shape: f32[2,1,64], index: 6, kind: input, shape index: {}]   ;;  %s3316_s7 = inlined_call_operand.vmem [shape: f32[2,1,32], index: 7, kind: input, shape index: {}]   ;;  %s3317_s8 = inlined_call_operand.hbm [shape: f32[8,32], index: 8, kind: output, shape index: {}]  }
   0x1   :  { %14 = vsyncpa [#allocation6], 0 }
   0x2   :  { %15 = vsyncpa [#allocation9], 0 }
   0x3   :  { %16 = vsyncpa [#allocation4], 0  ;;  %s2954_s27 = smov [#allocation5]  }
   0x4   :  { %s32_s28 = sshll.u32 %s2954_s27, 4  ;;  %s33_s28 = int_to_ptr.vmem [resolvable:$true] %s32_s28 }
   0x5   :  { %s2834_s29 = scalar_lea.vmem %s33_s28, 256  ;;  %p2839_p1 = scmp.lt.s32.totalorder %s33_s28, %s33_s28 }
   0x6   :  { %p2835_p0 = scmp.ne.s32.totalorder %s33_s28, %s2834_s29  ;;  %p2840_p2 = scmp.lt.s32.totalorder %s2834_s29, %s2834_s29 }
   0x8   :  { %p2841_p3 = por %p2840_p2, %p2839_p1 }
   0xa   :  { %p2842_p4 = pnand %p2841_p3, %p2835_p0 }
   0xc   :  { %2845 = shalt.err (!%p2842_p4)
}
   0xd   :  { %s2955_s30 = smov 128   ;;  %s2956_s9 = smov 8  }
   0xe   :  { %38 = dma.hbm_to_vmem [thread:$0]  %s3310_s1, 256, %s33_s28, [#allocation6], %s2955_s30, %s2955_s30, %s2956_s9  }
   0xf   :  { %s2957_s12 = smov [#allocation8]   ;;  %s2958_s14 = smov [#allocation2]  }
  0x10   :  { %s56_s13 = sshll.u32 %s2957_s12, 4  ;;  %s23_s15 = sshll.u32 %s2958_s14, 4  ;;  %s57_s13 = int_to_ptr.vmem [resolvable:$true] %s56_s13  ;;  %s24_s15 = int_to_ptr.vmem [resolvable:$true] %s23_s15 }
  0x11   :  { %s2854_s16 = scalar_lea.vmem %s57_s13, 512  ;;  %p2859_p6 = scmp.lt.s32.totalorder %s57_s13, %s57_s13 }
  0x12   :  { %p2855_p5 = scmp.ne.s32.totalorder %s57_s13, %s2854_s16  ;;  %p2860_p7 = scmp.lt.s32.totalorder %s2854_s16, %s2854_s16 }
  0x14   :  { %p2861_p8 = por %p2860_p7, %p2859_p6 }
  0x16   :  { %p2862_p9 = pnand %p2861_p8, %p2855_p5 }
  0x18   :  { %2865 = shalt.err (!%p2862_p9)
}
  0x19   :  { %62 = dma.hbm_to_vmem [thread:$0]  %s3312_s3, 512, %s57_s13, [#allocation9], %s2955_s30, %s2955_s30, %s2956_s9  }
  0x1a   :  { %s2874_s1 = scalar_lea.vmem %s24_s15, 128  ;;  %p2879_p11 = scmp.lt.s32.totalorder %s24_s15, %s24_s15 }
  0x1b   :  { %p2875_p10 = scmp.ne.s32.totalorder %s24_s15, %s2874_s1  ;;  %p2880_p12 = scmp.lt.s32.totalorder %s2874_s1, %s2874_s1 }
  0x1d   :  { %p2881_p13 = por %p2880_p12, %p2879_p11 }
  0x1f   :  { %p2882_p0 = pnand %p2881_p13, %p2875_p10 }
  0x21   :  { %2885 = shalt.err (!%p2882_p0)
}
  0x22   :  { %26 = dma.hbm_to_vmem [thread:$0]  %s3309_s0, 128, %s24_s15, [#allocation3]  }
  0x23   :  { %s2959_s21 = smov [#allocation7]   ;;  %s2960_s23 = smov [#allocation10]  }
  0x24   :  { %s44_s22 = sshll.u32 %s2959_s21, 4  ;;  %s68_s24 = sshll.u32 %s2960_s23, 4  ;;  %s45_s22 = int_to_ptr.vmem [resolvable:$true] %s44_s22  ;;  %s69_s24 = int_to_ptr.vmem [resolvable:$true] %s68_s24 }
  0x25   :  { %s2894_s25 = scalar_lea.vmem %s45_s22, 1024  ;;  %p2899_p2 = scmp.lt.s32.totalorder %s45_s22, %s45_s22 }
  0x26   :  { %p2895_p1 = scmp.ne.s32.totalorder %s45_s22, %s2894_s25  ;;  %p2900_p3 = scmp.lt.s32.totalorder %s2894_s25, %s2894_s25 }
  0x28   :  { %p2901_p4 = por %p2900_p3, %p2899_p2 }
  0x2a   :  { %p2902_p5 = pnand %p2901_p4, %p2895_p1 }
  0x2c   :  { %2905 = shalt.err (!%p2902_p5)
}
  0x2d   :  { %50 = dma.hbm_to_vmem [thread:$0]  %s3311_s2, 1024, %s45_s22, [#allocation6], %s2955_s30, %s2955_s30, %s2956_s9  }
  0x2e   :  { %s2914_s0 = scalar_lea.vmem %s69_s24, 1024  ;;  %p2919_p7 = scmp.lt.s32.totalorder %s69_s24, %s69_s24 }
  0x2f   :  { %p2915_p6 = scmp.ne.s32.totalorder %s69_s24, %s2914_s0  ;;  %p2920_p8 = scmp.lt.s32.totalorder %s2914_s0, %s2914_s0 }
  0x31   :  { %p2921_p9 = por %p2920_p8, %p2919_p7 }
  0x33   :  { %p2922_p10 = pnand %p2921_p9, %p2915_p6 }
  0x35   :  { %2925 = shalt.err (!%p2922_p10)
}
  0x36   :  { %74 = dma.hbm_to_vmem [thread:$0]  %s3313_s4, 1024, %s69_s24, [#allocation9], %s2955_s30, %s2955_s30, %s2956_s9  }
  0x37   :  { %2946 = dma.done.wait [#allocation3], 128  }
  0x38   :  { %2947 = vsyncadd [#allocation3], 4294967168 }
  0x39   :  { %2948 = dma.done.wait [#allocation6], 1280  }
  0x3a   :  { %2949 = vsyncadd [#allocation6], 4294966016 }
  0x3b   :  { %2950 = dma.done.wait [#allocation9], 1536  }
  0x3c   :  { %2951 = vsyncadd [#allocation9], 4294965760  ;;  %v2961_v0 = vmov 0.0   ;;  %vm2962_vm0 = vmmov 0   ;;  %v104_v1 = vld [vmem:[#allocation8 + $0x8] sm:$0xff]  ;;  %v102_v2 = vld [vmem:[#allocation7 + $0x18] sm:$0xff] }
  0x3d   :  { %2589 = vmatprep.subr.mxu0 %v2961_v0  ;;  %2597 = vmatprep.mubr.msk.f32.mxu0 %vm2962_vm0, %v2961_v0  ;;  %v103_v3 = vld [vmem:[#allocation8] sm:$0xff]  ;;  %vm198_vm1 = vcmask 130048   ;;  %v3046_v4 = vld [vmem:[#allocation5] sm:$0xff]  ;;  %v3049_v6 = vld [vmem:[#allocation5 + $0x8] sm:$0xff]  ;;  %vm118_vm2 = vcmask 261120   ;;  %vm286_vm3 = vcmask 64512  }
  0x3e   :  { %2600 = vmatprep.subr.mxu1 %v104_v1  ;;  %2590 = vmatpush3.msra.mxu0 %v102_v2  ;;  %v101_v5 = vld [vmem:[#allocation7 + $0x10] sm:$0xff]  ;;  %v100_v7 = vld [vmem:[#allocation7 + $0x8] sm:$0xff]  ;;  %v99_v8 = vld [vmem:[#allocation7] sm:$0xff]  ;;  %s2963_s9 = smov 120   ;;  %s2964_s10 = smov 96  }
  0x3f   :  { %2601 = vmatpush3.msra.mxu1 %v104_v1  ;;  %2591 = vmatprep.subr.mxu0 %v2961_v0  ;;  %v98_v9 = vld [vmem:[#allocation2] sm:$0xff]  ;;  %s2965_s11 = smov 112   ;;  %s2966_s12 = smov 88   ;;  %v105_v40 = vld [vmem:[#allocation10] sm:$0xff] }
  0x40   :  { %2602 = vmatprep.subr.mxu1 %v103_v3  ;;  %2604 = vmatprep.mubr.msk.f32.mxu1 %vm198_vm1, %v3046_v4  ;;  %v2454_v10 = vld [vmem:[%s3315_s6] ss:$0 sm:$0xff]  ;;  %s2967_s13 = smov 104   ;;  %s2968_s14 = smov 80  }
  0x41   :  { %2603 = vmatpush3.msra.mxu1 %v103_v3  ;;  %2592 = vmatpush3.msra.mxu0 %v101_v5  ;;  %v2452_v14 = vld [vmem:[%s3314_s5] ss:$0 sm:$0xff]  ;;  %s2969_s15 = smov 72  }
  0x42   :  { %2605 = vmatmul.mubr.msk.f32.vlgmr.msra.gmra.mxu1 %vm198_vm1, %v3049_v6  ;;  %2593 = vmatprep.subr.mxu0 %v2961_v0  ;;  %v106_v62 = vld [vmem:[#allocation10 + $0x8] sm:$0xff] }
  0x43   :  { %2594 = vmatpush3.msra.mxu0 %v100_v7  ;;  %2607 = vmatprep.subr.mxu1 %v2961_v0 }
  0x44   :  { %2595 = vmatprep.subr.mxu0 %v2961_v0  ;;  %2611 = vmatprep.mubr.msk.f32.mxu1 %vm2962_vm0, %v2961_v0 }
  0x45   :  { %2596 = vmatpush3.msra.mxu0 %v99_v8 }
  0x46   :  { %2598 = vmatmul.mubr.msk.f32.vlgmr.msra.gmra.mxu0 %vm118_vm2, %v98_v9  ;;  %2614 = vmatprep.subr.mxu0 %v2961_v0 }
  0x47   :  { %2618 = vmatprep.mubr.msk.f32.mxu0 %vm2962_vm0, %v2961_v0 }
 0x102   :  { %v2606_v11 = vpop.f32.mrf.mxu1 }
 0x103   :  { %v3067_v12 = vadd.f32 %v2606_v11, %v2454_v10 }
 0x104   :  { %v271_v13 = vpop.f32.mrf.mxu1 }
 0x105   :  { %534 = vrot.lane.b32.xlu0 %v3067_v12, %s2963_s9  ;;  %2608 = vmatpush3.xpose.msk.msra.mxu1 %vm286_vm3, %v3067_v12  ;;  %v3077_v16 = vadd.f32 %v2454_v10, %v271_v13 }
 0x106   :  { %v188_v15 = vpop.f32.mrf.mxu0  ;;  %2609 = vmatprep.subr.mxu1 %v2961_v0 }
 0x107   :  { %v189_v17 = vadd.f32 %v2452_v14, %v188_v15 }
 0x108   :  { %v2599_v18 = vpop.f32.mrf.mxu0 }
 0x109   :  { %532 = vrot.lane.b32.xlu0 %v3077_v16, %s2963_s9  ;;  %2610 = vmatpush3.xpose.msk.msra.mxu1 %vm286_vm3, %v3077_v16 }
 0x10a   :  { %530 = vrot.lane.b32.xlu1 %v189_v17, %s2963_s9  ;;  %2626 = vmatprep.subr.mxu1 %v2961_v0 }
 0x10c   :  { %2612 = vmatmul.mubr.msk.f32.vlgmr.msra.gmra.mxu1 %vm286_vm3, %v189_v17 }
 0x10d   :  { %378 = vrot.lane.b32.xlu0 %v3067_v12, %s2964_s10  ;;  %2630 = vmatprep.mubr.msk.f32.mxu1 %vm2962_vm0, %v2961_v0 }
 0x111   :  { %376 = vrot.lane.b32.xlu0 %v3077_v16, %s2964_s10 }
 0x115   :  { %780 = vrot.lane.b32.xlu0 %v3067_v12, %s2965_s11 }
 0x119   :  { %778 = vrot.lane.b32.xlu0 %v3077_v16, %s2965_s11 }
 0x11d   :  { %776 = vrot.lane.b32.xlu0 %v189_v17, %s2965_s11 }
 0x177   :  { %v535_v19 = vpop.permute.xlu0 %534 }
 0x178   :  { %2627 = vmatpush3.xpose.msk.msra.mxu1 %vm286_vm3, %v535_v19 }
 0x179   :  { %2628 = vmatprep.subr.mxu1 %v2961_v0 }
 0x17b   :  { %v533_v20 = vpop.permute.xlu0 %532 }
 0x17c   :  { %2629 = vmatpush3.xpose.msk.msra.mxu1 %vm286_vm3, %v533_v20  ;;  %v531_v21 = vpop.permute.xlu1 %530 }
 0x17d   :  { %2645 = vmatprep.subr.mxu1 %v2961_v0 }
 0x17f   :  { %v379_v22 = vpop.permute.xlu0 %378  ;;  %2631 = vmatmul.mubr.msk.f32.vlgmr.msra.gmra.mxu1 %vm286_vm3, %v531_v21  ;;  %v2457_v21 = vld [vmem:[%s3316_s7] ss:$0 sm:$0xff] }
 0x180   :  { %2615 = vmatpush3.msra.mxu0 %v379_v22  ;;  %2649 = vmatprep.mubr.msk.f32.mxu1 %vm2962_vm0, %v2961_v0 }
 0x181   :  { %2616 = vmatprep.subr.mxu0 %v2961_v0 }
 0x183   :  { %v377_v23 = vpop.permute.xlu0 %376 }
 0x184   :  { %2617 = vmatpush3.msra.mxu0 %v377_v23 }
 0x185   :  { %2621 = vmatprep.subr.mxu0 %v2961_v0 }
 0x187   :  { %v781_v24 = vpop.permute.xlu0 %780 }
 0x188   :  { %2646 = vmatpush3.xpose.msk.msra.mxu1 %vm286_vm3, %v781_v24 }
 0x189   :  { %2647 = vmatprep.subr.mxu1 %v2961_v0 }
 0x18b   :  { %v779_v25 = vpop.permute.xlu0 %778 }
 0x18c   :  { %2648 = vmatpush3.xpose.msk.msra.mxu1 %vm286_vm3, %v779_v25 }
 0x18d   :  { %2664 = vmatprep.subr.mxu1 %v2961_v0 }
 0x18f   :  { %v777_v26 = vpop.permute.xlu0 %776 }
 0x190   :  { %2650 = vmatmul.mubr.msk.f32.vlgmr.msra.gmra.mxu1 %vm286_vm3, %v777_v26 }
 0x191   :  { %2668 = vmatprep.mubr.msk.f32.mxu1 %vm2962_vm0, %v2961_v0 }
 0x1cc   :  { %v362_v27 = vpop.f32.mrf.mxu1 }
 0x1cd   :  { %v366_v28 = vsel %vm198_vm1, %v362_v27, -inf }
 0x1ce   :  { %367 = vmax.xlane.f32.xlu1 %v366_v28  ;;  %v2613_v29 = vpop.f32.mrf.mxu1 }
 0x23f   :  { %v608_v30 = vpop.f32.mrf.mxu1 }
 0x240   :  { %v612_v31 = vsel %vm198_vm1, %v608_v30, -inf }
 0x241   :  { %613 = vmax.xlane.f32.xlu1 %v612_v31  ;;  %v2632_v32 = vpop.f32.mrf.mxu1 }
 0x242   :  { %v108_v32 = vld [vmem:[#allocation10 + $0x18] sm:$0xff] }
 0x250   :  { %v854_v33 = vpop.f32.mrf.mxu1 }
 0x251   :  { %v858_v41 = vsel %vm198_vm1, %v854_v33, -inf }
 0x252   :  { %624 = vrot.lane.b32.xlu1 %v3067_v12, %s2966_s12  ;;  %v2651_v34 = vpop.f32.mrf.mxu1 }
 0x253   :  { %v1272_v34 = vld [vmem:[#allocation7 + $0x38] sm:$0xff] }
 0x256   :  { %1026 = vrot.lane.b32.xlu1 %v3067_v12, %s2967_s13 }
 0x257   :  { %v368_v35 = vpop.xlane.xlu1 %367 }
 0x258   :  { %v369_v36 = vsub.f32 %v362_v27, %v368_v35  ;;  %v1271_v35 = vld [vmem:[#allocation7 + $0x30] sm:$0xff] }
 0x25a   :  { %v370_v37 = vmul.f32 1.442695, %v369_v36  ;;  %1024 = vrot.lane.b32.xlu1 %v3077_v16, %s2967_s13 }
 0x25c   :  { %2794 = vpow2.f32 %v370_v37 }
 0x25e   :  { %1022 = vrot.lane.b32.xlu1 %v189_v17, %s2967_s13  ;;  %v107_v17 = vld [vmem:[#allocation10 + $0x10] sm:$0xff] }
 0x269   :  { %v2795_v38 = vpop.eup %2794 }
 0x26a   :  { %2619 = vmatmul.mubr.msk.f32.vlgmr.msra.gmra.mxu0 %vm198_vm1, %v2795_v38  ;;  %v372_v39 = vsel %vm198_vm1, %v2795_v38, 0.0 }
 0x26b   :  { %373 = vadd.xlane.f32.xlu0 %v372_v39  ;;  %2623 = vmatprep.mubr.msk.f32.mxu0 %vm2962_vm0, %v2961_v0 }
 0x26c   :  { %2622 = vmatpush3.msra.mxu0 %v105_v40 }
 0x26d   :  { %2633 = vmatprep.subr.mxu0 %v2961_v0 }
 0x281   :  { %622 = vrot.lane.b32.xlu0 %v3077_v16, %s2966_s12 }
 0x2a0   :  { %859 = vmax.xlane.f32.xlu0 %v858_v41 }
 0x2b6   :  { %868 = vrot.lane.b32.xlu0 %v3077_v16, %s2968_s14 }
 0x2ca   :  { %v614_v42 = vpop.xlane.xlu1 %613 }
 0x2cb   :  { %v615_v43 = vsub.f32 %v608_v30, %v614_v42 }
 0x2cd   :  { %v616_v44 = vmul.f32 1.442695, %v615_v43 }
 0x2ce   :  { %v625_v45 = vpop.permute.xlu1 %624 }
 0x2cf   :  { %2796 = vpow2.f32 %v616_v44  ;;  %v1274_v44 = vld [vmem:[#allocation8 + $0x10] sm:$0xff] }
 0x2d2   :  { %v1027_v46 = vpop.permute.xlu1 %1026 }
 0x2d3   :  { %2665 = vmatpush3.xpose.msk.msra.mxu1 %vm286_vm3, %v1027_v46  ;;  %v1269_v46 = vld [vmem:[#allocation7 + $0x20] sm:$0xff] }
 0x2d4   :  { %2666 = vmatprep.subr.mxu1 %v2961_v0 }
 0x2d6   :  { %v1025_v47 = vpop.permute.xlu1 %1024 }
 0x2d7   :  { %2667 = vmatpush3.xpose.msk.msra.mxu1 %vm286_vm3, %v1025_v47 }
 0x2d8   :  { %2683 = vmatprep.subr.mxu1 %v2961_v0 }
 0x2da   :  { %v1023_v48 = vpop.permute.xlu1 %1022 }
 0x2db   :  { %2669 = vmatmul.mubr.msk.f32.vlgmr.msra.gmra.mxu1 %vm286_vm3, %v1023_v48 }
 0x2dc   :  { %v2797_v49 = vpop.eup %2796  ;;  %2691 = vmatprep.mubr.msk.f32.mxu1 %vm2962_vm0, %v2961_v0  ;;  %2684 = vmatpush3.msra.mxu1 %v1272_v34 }
 0x2dd   :  { %v618_v50 = vsel %vm198_vm1, %v2797_v49, 0.0  ;;  %2685 = vmatprep.subr.mxu1 %v2961_v0 }
 0x2de   :  { %619 = vadd.xlane.f32.xlu1 %v618_v50  ;;  %2686 = vmatpush3.msra.mxu1 %v1271_v35 }
 0x2df   :  { %2687 = vmatprep.subr.mxu1 %v2961_v0 }
 0x2ef   :  { %870 = vrot.lane.b32.xlu1 %v3067_v12, %s2968_s14 }
 0x2f4   :  { %v374_v51 = vpop.xlane.xlu0 %373 }
 0x2f5   :  { %2798 = vrcp.f32 %v374_v51 }
 0x2f8   :  { %v623_v52 = vpop.permute.xlu0 %622 }
 0x302   :  { %v2799_v54 = vpop.eup %2798 }
 0x329   :  { %v860_v53 = vpop.xlane.xlu0 %859 }
 0x32a   :  { %v861_v55 = vsub.f32 %v854_v33, %v860_v53  ;;  %v451_v56 = vpop.f32.mrf.mxu0  ;;  %v1275_v33 = vld [vmem:[#allocation8 + $0x18] sm:$0xff] }
 0x32b   :  { %v455_v57 = vmul.f32 %v2799_v54, %v451_v56  ;;  %v2481_v54 = vld [vmem:[%s3314_s5 + $0x1] ss:$0 sm:$0xff] }
 0x32c   :  { %v862_v58 = vmul.f32 1.442695, %v861_v55  ;;  %v2620_v59 = vpop.f32.mrf.mxu0 }
 0x32d   :  { %2624 = vmatmul.mubr.msk.f32.vlgmr.msra.gmra.mxu0 %vm286_vm3, %v455_v57  ;;  %v869_v13 = vpop.permute.xlu0 %868 }
 0x32e   :  { %2800 = vpow2.f32 %v862_v58  ;;  %2634 = vmatpush3.msra.mxu0 %v625_v45  ;;  %2637 = vmatprep.mubr.msk.f32.mxu0 %vm2962_vm0, %v2961_v0  ;;  %v1270_v45 = vld [vmem:[#allocation7 + $0x28] sm:$0xff] }
 0x32f   :  { %2635 = vmatprep.subr.mxu0 %v2961_v0  ;;  %2688 = vmatpush3.msra.mxu1 %v1270_v45 }
 0x330   :  { %2636 = vmatpush3.msra.mxu0 %v623_v52  ;;  %2689 = vmatprep.subr.mxu1 %v2961_v0 }
 0x331   :  { %2638 = vmatmul.mubr.msk.f32.vlgmr.msra.gmra.mxu0 %vm198_vm1, %v2797_v49  ;;  %2640 = vmatprep.subr.mxu0 %v2961_v0 }
 0x332   :  { %2642 = vmatprep.mubr.msk.f32.mxu0 %vm2962_vm0, %v2961_v0  ;;  %2641 = vmatpush3.msra.mxu0 %v106_v62 }
 0x333   :  { %2652 = vmatprep.subr.mxu0 %v2961_v0  ;;  %2690 = vmatpush3.msra.mxu1 %v1269_v46 }
 0x334   :  { %2708 = vmatprep.subr.mxu1 %v2961_v0 }
 0x33b   :  { %v2801_v60 = vpop.eup %2800 }
 0x33c   :  { %v864_v61 = vsel %vm198_vm1, %v2801_v60, 0.0 }
 0x33d   :  { %865 = vadd.xlane.f32.xlu1 %v864_v61 }
 0x34e   :  { %1116 = vrot.lane.b32.xlu1 %v3067_v12, %s2969_s15 }
 0x367   :  { %v620_v3 = vpop.xlane.xlu1 %619 }
 0x368   :  { %2802 = vrcp.f32 %v620_v3 }
 0x36b   :  { %v871_v12 = vpop.permute.xlu1 %870 }
 0x375   :  { %v2803_v8 = vpop.eup %2802 }
 0x39b   :  { %v1100_v63 = vpop.f32.mrf.mxu1 }
 0x39c   :  { %v1104_v1 = vsel %vm198_vm1, %v1100_v63, -inf }
 0x39d   :  { %1105 = vmax.xlane.f32.xlu0 %v1104_v1  ;;  %v2670_v2 = vpop.f32.mrf.mxu1 }
 0x3b3   :  { %1114 = vrot.lane.b32.xlu0 %v3077_v16, %s2969_s15 }
 0x3c6   :  { %v866_v20 = vpop.xlane.xlu1 %865 }
 0x3ca   :  { %v1117_v30 = vpop.permute.xlu1 %1116 }
 0x3ed   :  { %v525_v5 = vpop.f32.mrf.mxu0 }
 0x3ee   :  { %v529_v22 = vadd.f32 %v2457_v21, %v525_v5 }
 0x3ef   :  { %v2625_v7 = vpop.f32.mrf.mxu0 }
 0x3f1   :  { %v697_v9 = vpop.f32.mrf.mxu0 }
 0x3f2   :  { %v701_v10 = vmul.f32 %v2803_v8, %v697_v9 }
 0x3f3   :  { %v2639_v11 = vpop.f32.mrf.mxu0 }
 0x3f4   :  { %2643 = vmatmul.mubr.msk.f32.vlgmr.msra.gmra.mxu0 %vm286_vm3, %v701_v10 }
 0x3f5   :  { %2653 = vmatpush3.msra.mxu0 %v871_v12  ;;  %2656 = vmatprep.mubr.msk.f32.mxu0 %vm2962_vm0, %v2961_v0 }
 0x3f6   :  { %2654 = vmatprep.subr.mxu0 %v2961_v0 }
 0x3f7   :  { %2655 = vmatpush3.msra.mxu0 %v869_v13 }
 0x3f8   :  { %2657 = vmatmul.mubr.msk.f32.vlgmr.msra.gmra.mxu0 %vm198_vm1, %v2801_v60  ;;  %2659 = vmatprep.subr.mxu0 %v2961_v0 }
 0x3f9   :  { %2661 = vmatprep.mubr.msk.f32.mxu0 %vm2962_vm0, %v2961_v0  ;;  %2660 = vmatpush3.msra.mxu0 %v107_v17 }
 0x3fa   :  { %2671 = vmatprep.subr.mxu0 %v2961_v0 }
 0x426   :  { %v1106_v14 = vpop.xlane.xlu0 %1105 }
 0x427   :  { %v1107_v15 = vsub.f32 %v1100_v63, %v1106_v14 }
 0x429   :  { %v1108_v16 = vmul.f32 1.442695, %v1107_v15 }
 0x42a   :  { %v1115_v31 = vpop.permute.xlu0 %1114 }
 0x42b   :  { %2804 = vpow2.f32 %v1108_v16 }
 0x42c   :  { %2806 = vrcp.f32 %v866_v20 }
 0x438   :  { %v2805_v18 = vpop.eup %2804 }
 0x439   :  { %v1110_v19 = vsel %vm198_vm1, %v2805_v18, 0.0  ;;  %v2807_v26 = vpop.eup %2806 }
 0x43a   :  { %1111 = vadd.xlane.f32.xlu1 %v1110_v19 }
 0x4b4   :  { %v771_v23 = vpop.f32.mrf.mxu0 }
 0x4b5   :  { %v775_v24 = vadd.f32 %v771_v23, %v529_v22 }
 0x4b6   :  { %v2644_v25 = vpop.f32.mrf.mxu0 }
 0x4b8   :  { %v943_v27 = vpop.f32.mrf.mxu0 }
 0x4b9   :  { %v947_v28 = vmul.f32 %v2807_v26, %v943_v27 }
 0x4ba   :  { %v2658_v29 = vpop.f32.mrf.mxu0 }
 0x4bb   :  { %2662 = vmatmul.mubr.msk.f32.vlgmr.msra.gmra.mxu0 %vm286_vm3, %v947_v28 }
 0x4bc   :  { %2672 = vmatpush3.msra.mxu0 %v1117_v30  ;;  %2675 = vmatprep.mubr.msk.f32.mxu0 %vm2962_vm0, %v2961_v0 }
 0x4bd   :  { %2673 = vmatprep.subr.mxu0 %v2961_v0 }
 0x4be   :  { %2674 = vmatpush3.msra.mxu0 %v1115_v31 }
 0x4bf   :  { %2676 = vmatmul.mubr.msk.f32.vlgmr.msra.gmra.mxu0 %vm198_vm1, %v2805_v18  ;;  %2678 = vmatprep.subr.mxu0 %v2961_v0  ;;  %v1277_v18 = vld [vmem:[#allocation10 + $0x20] sm:$0xff] }
 0x4c0   :  { %2680 = vmatprep.mubr.msk.f32.mxu0 %vm2962_vm0, %v2961_v0  ;;  %2679 = vmatpush3.msra.mxu0 %v108_v32 }
 0x4c1   :  { %2694 = vmatprep.subr.mxu0 %v1275_v33 }
 0x4c3   :  { %v1112_v36 = vpop.xlane.xlu1 %1111 }
 0x4c4   :  { %2808 = vrcp.f32 %v1112_v36 }
 0x4d1   :  { %v2809_v40 = vpop.eup %2808 }
 0x57b   :  { %v1017_v37 = vpop.f32.mrf.mxu0 }
 0x57c   :  { %v1021_v38 = vadd.f32 %v1017_v37, %v775_v24 }
 0x57d   :  { %v2663_v39 = vpop.f32.mrf.mxu0 }
 0x57e   :  { %v1278_v39 = vld [vmem:[#allocation10 + $0x28] sm:$0xff] }
 0x57f   :  { %v1189_v41 = vpop.f32.mrf.mxu0 }
 0x580   :  { %v1193_v42 = vmul.f32 %v2809_v40, %v1189_v41 }
 0x581   :  { %v2677_v43 = vpop.f32.mrf.mxu0 }
 0x582   :  { %2681 = vmatmul.mubr.msk.f32.vlgmr.msra.gmra.mxu0 %vm286_vm3, %v1193_v42 }
 0x583   :  { %2695 = vmatpush3.msra.mxu0 %v1275_v33  ;;  %2698 = vmatprep.mubr.msk.f32.mxu0 %vm198_vm1, %v3046_v4 }
 0x584   :  { %2696 = vmatprep.subr.mxu0 %v1274_v44 }
 0x585   :  { %2697 = vmatpush3.msra.mxu0 %v1274_v44 }
 0x586   :  { %2699 = vmatmul.mubr.msk.f32.vlgmr.msra.gmra.mxu0 %vm198_vm1, %v3049_v6  ;;  %2701 = vmatprep.subr.mxu0 %v2961_v0  ;;  %v2483_v6 = vld [vmem:[%s3315_s6 + $0x1] ss:$0 sm:$0xff] }
 0x587   :  { %2705 = vmatprep.mubr.msk.f32.mxu0 %vm2962_vm0, %v2961_v0 }
 0x642   :  { %v1263_v47 = vpop.f32.mrf.mxu0 }
 0x643   :  { %v1267_v4 = vadd.f32 %v1263_v47, %v1021_v38 }
 0x644   :  { %v2682_v48 = vpop.f32.mrf.mxu0 }
 0x645   :  { %2692 = vmatmul.mubr.msk.f32.vlgmr.msra.gmra.mxu1 %vm118_vm2, %v1267_v4 }
 0x646   :  { %v2700_v49 = vpop.f32.mrf.mxu0  ;;  %2712 = vmatprep.mubr.msk.f32.mxu1 %vm2962_vm0, %v2961_v0 }
 0x647   :  { %v3196_v50 = vadd.f32 %v2700_v49, %v2483_v6 }
 0x648   :  { %v1438_v51 = vpop.f32.mrf.mxu0 }
 0x649   :  { %1544 = vrot.lane.b32.xlu1 %v3196_v50, %s2964_s10  ;;  %1700 = vrot.lane.b32.xlu0 %v3196_v50, %s2963_s9  ;;  %v3202_v52 = vadd.f32 %v2483_v6, %v1438_v51 }
 0x64a   :  { %2702 = vmatpush3.xpose.msk.msra.mxu0 %vm286_vm3, %v3196_v50 }
 0x64b   :  { %2703 = vmatprep.subr.mxu0 %v2961_v0 }
 0x64d   :  { %1946 = vrot.lane.b32.xlu1 %v3196_v50, %s2965_s11  ;;  %1698 = vrot.lane.b32.xlu0 %v3202_v52, %s2963_s9 }
 0x64e   :  { %2704 = vmatpush3.xpose.msk.msra.mxu0 %vm286_vm3, %v3202_v52 }
 0x64f   :  { %2720 = vmatprep.subr.mxu0 %v2961_v0 }
 0x651   :  { %1944 = vrot.lane.b32.xlu1 %v3202_v52, %s2965_s11 }
 0x6bb   :  { %v1545_v53 = vpop.permute.xlu1 %1544  ;;  %v1701_v56 = vpop.permute.xlu0 %1700 }
 0x6bc   :  { %2709 = vmatpush3.msra.mxu1 %v1545_v53 }
 0x6bd   :  { %2710 = vmatprep.subr.mxu1 %v2961_v0 }
 0x6bf   :  { %v1699_v59 = vpop.permute.xlu0 %1698  ;;  %v1947_v60 = vpop.permute.xlu1 %1946 }
 0x6c3   :  { %v1945_v62 = vpop.permute.xlu1 %1944 }
 0x705   :  { %v1362_v55 = vpop.f32.mrf.mxu1 }
 0x706   :  { %v1363_v57 = vadd.f32 %v2481_v54, %v1362_v55 }
 0x707   :  { %v2693_v58 = vpop.f32.mrf.mxu1 }
 0x708   :  { %1942 = vrot.lane.b32.xlu1 %v1363_v57, %s2965_s11  ;;  %1696 = vrot.lane.b32.xlu0 %v1363_v57, %s2963_s9 }
 0x709   :  { %2706 = vmatmul.mubr.msk.f32.vlgmr.msra.gmra.mxu0 %vm286_vm3, %v1363_v57 }
 0x70a   :  { %2721 = vmatpush3.xpose.msk.msra.mxu0 %vm286_vm3, %v1701_v56  ;;  %2724 = vmatprep.mubr.msk.f32.mxu0 %vm2962_vm0, %v2961_v0 }
 0x70b   :  { %2722 = vmatprep.subr.mxu0 %v2961_v0 }
 0x70e   :  { %2723 = vmatpush3.xpose.msk.msra.mxu0 %vm286_vm3, %v1699_v59 }
 0x70f   :  { %2739 = vmatprep.subr.mxu0 %v2961_v0 }
 0x77a   :  { %v1697_v61 = vpop.permute.xlu0 %1696  ;;  %v1943_v63 = vpop.permute.xlu1 %1942 }
 0x77b   :  { %2725 = vmatmul.mubr.msk.f32.vlgmr.msra.gmra.mxu0 %vm286_vm3, %v1697_v61 }
 0x77c   :  { %2740 = vmatpush3.xpose.msk.msra.mxu0 %vm286_vm3, %v1947_v60  ;;  %2743 = vmatprep.mubr.msk.f32.mxu0 %vm2962_vm0, %v2961_v0 }
 0x77d   :  { %2741 = vmatprep.subr.mxu0 %v2961_v0 }
 0x780   :  { %2742 = vmatpush3.xpose.msk.msra.mxu0 %vm286_vm3, %v1945_v62 }
 0x781   :  { %2758 = vmatprep.subr.mxu0 %v2961_v0 }
 0x783   :  { %2744 = vmatmul.mubr.msk.f32.vlgmr.msra.gmra.mxu0 %vm286_vm3, %v1943_v63 }
 0x784   :  { %2762 = vmatprep.mubr.msk.f32.mxu0 %vm2962_vm0, %v2961_v0 }
 0x7c9   :  { %v1528_v1 = vpop.f32.mrf.mxu0 }
 0x7ca   :  { %v1532_v2 = vsel %vm198_vm1, %v1528_v1, -inf }
 0x7cb   :  { %1533 = vmax.xlane.f32.xlu0 %v1532_v2  ;;  %v2707_v3 = vpop.f32.mrf.mxu0 }
 0x7e1   :  { %1542 = vrot.lane.b32.xlu0 %v3202_v52, %s2964_s10 }
 0x83b   :  { %v1774_v5 = vpop.f32.mrf.mxu0 }
 0x83c   :  { %v1778_v7 = vsel %vm198_vm1, %v1774_v5, -inf }
 0x83d   :  { %1779 = vmax.xlane.f32.xlu0 %v1778_v7  ;;  %v2726_v8 = vpop.f32.mrf.mxu0  ;;  %v1280_v7 = vld [vmem:[#allocation10 + $0x38] sm:$0xff] }
 0x843   :  { %v2020_v9 = vpop.f32.mrf.mxu0 }
 0x844   :  { %v2024_v17 = vsel %vm198_vm1, %v2020_v9, -inf }
 0x845   :  { %v2745_v10 = vpop.f32.mrf.mxu0 }
 0x853   :  { %1788 = vrot.lane.b32.xlu0 %v3202_v52, %s2966_s12 }
 0x854   :  { %v1534_v11 = vpop.xlane.xlu0 %1533 }
 0x855   :  { %v1535_v12 = vsub.f32 %v1528_v1, %v1534_v11 }
 0x857   :  { %v1536_v13 = vmul.f32 1.442695, %v1535_v12  ;;  %2188 = vrot.lane.b32.xlu0 %v1363_v57, %s2967_s13  ;;  %v2486_v57 = vld [vmem:[%s3316_s7 + $0x1] ss:$0 sm:$0xff]  ;;  %s2970_s7 = smov [#allocation11]  }
 0x858   :  { %v1543_v14 = vpop.permute.xlu0 %1542  ;;  %s2441_s21 = sshll.u32 %s2970_s7, 4  ;;  %s2442_s21 = int_to_ptr.vmem [resolvable:$true] %s2441_s21 }
 0x859   :  { %2810 = vpow2.f32 %v1536_v13  ;;  %2711 = vmatpush3.msra.mxu1 %v1543_v14  ;;  %s2926_s22 = scalar_lea.vmem %s2442_s21, 128  ;;  %p2931_p12 = scmp.lt.s32.totalorder %s2442_s21, %s2442_s21 }
 0x85a   :  { %2715 = vmatprep.subr.mxu1 %v2961_v0  ;;  %p2927_p11 = scmp.ne.s32.totalorder %s2442_s21, %s2926_s22  ;;  %p2932_p13 = scmp.lt.s32.totalorder %s2926_s22, %s2926_s22 }
 0x85c   :  { %p2933_p0 = por %p2932_p13, %p2931_p12 }
 0x85e   :  { %p2934_p1 = pnand %p2933_p0, %p2927_p11 }
 0x866   :  { %v2811_v15 = vpop.eup %2810 }
 0x867   :  { %2713 = vmatmul.mubr.msk.f32.vlgmr.msra.gmra.mxu1 %vm198_vm1, %v2811_v15  ;;  %v1538_v16 = vsel %vm198_vm1, %v2811_v15, 0.0 }
 0x868   :  { %1539 = vadd.xlane.f32.xlu1 %v1538_v16  ;;  %2717 = vmatprep.mubr.msk.f32.mxu1 %vm2962_vm0, %v2961_v0 }
 0x869   :  { %2716 = vmatpush3.msra.mxu1 %v1277_v18 }
 0x86a   :  { %2727 = vmatprep.subr.mxu1 %v2961_v0 }
 0x876   :  { %2025 = vmax.xlane.f32.xlu0 %v2024_v17 }
 0x879   :  { %1790 = vrot.lane.b32.xlu1 %v3196_v50, %s2966_s12 }
 0x87d   :  { %2192 = vrot.lane.b32.xlu1 %v3196_v50, %s2967_s13 }
 0x881   :  { %2190 = vrot.lane.b32.xlu1 %v3202_v52, %s2967_s13 }
 0x88c   :  { %2036 = vrot.lane.b32.xlu0 %v3196_v50, %s2968_s14 }
 0x8c6   :  { %v1780_v19 = vpop.xlane.xlu0 %1779 }
 0x8c7   :  { %v1781_v20 = vsub.f32 %v1774_v5, %v1780_v19 }
 0x8c9   :  { %v1782_v21 = vmul.f32 1.442695, %v1781_v20 }
 0x8ca   :  { %v1789_v25 = vpop.permute.xlu0 %1788 }
 0x8cb   :  { %2812 = vpow2.f32 %v1782_v21 }
 0x8ce   :  { %v2189_v28 = vpop.permute.xlu0 %2188 }
 0x8d8   :  { %v2813_v22 = vpop.eup %2812 }
 0x8d9   :  { %v1784_v23 = vsel %vm198_vm1, %v2813_v22, 0.0 }
 0x8da   :  { %1785 = vadd.xlane.f32.xlu1 %v1784_v23 }
 0x8eb   :  { %2034 = vrot.lane.b32.xlu1 %v3202_v52, %s2968_s14 }
 0x8f1   :  { %v1540_v24 = vpop.xlane.xlu1 %1539 }
 0x8f5   :  { %v1791_v26 = vpop.permute.xlu1 %1790 }
 0x8f9   :  { %v2193_v27 = vpop.permute.xlu1 %2192 }
 0x8fa   :  { %2759 = vmatpush3.xpose.msk.msra.mxu0 %vm286_vm3, %v2193_v27 }
 0x8fb   :  { %2760 = vmatprep.subr.mxu0 %v2961_v0 }
 0x8fd   :  { %v2191_v29 = vpop.permute.xlu1 %2190 }
 0x8fe   :  { %2761 = vmatpush3.xpose.msk.msra.mxu0 %vm286_vm3, %v2191_v29 }
 0x8ff   :  { %v2026_v30 = vpop.xlane.xlu0 %2025 }
 0x900   :  { %v2027_v31 = vsub.f32 %v2020_v9, %v2026_v30 }
 0x901   :  { %2763 = vmatmul.mubr.msk.f32.vlgmr.msra.gmra.mxu0 %vm286_vm3, %v2189_v28 }
 0x902   :  { %v2028_v32 = vmul.f32 1.442695, %v2027_v31 }
 0x903   :  { %v2037_v6 = vpop.permute.xlu0 %2036 }
 0x904   :  { %2814 = vpow2.f32 %v2028_v32 }
 0x905   :  { %2816 = vrcp.f32 %v1540_v24 }
 0x911   :  { %v2815_v33 = vpop.eup %2814 }
 0x912   :  { %v2030_v34 = vsel %vm198_vm1, %v2815_v33, 0.0  ;;  %v2817_v35 = vpop.eup %2816 }
 0x913   :  { %2031 = vadd.xlane.f32.xlu1 %v2030_v34 }
 0x924   :  { %2280 = vrot.lane.b32.xlu1 %v3202_v52, %s2969_s15 }
 0x927   :  { %v1617_v36 = vpop.f32.mrf.mxu1 }
 0x928   :  { %v1621_v37 = vmul.f32 %v2817_v35, %v1617_v36 }
 0x929   :  { %v2714_v38 = vpop.f32.mrf.mxu1 }
 0x92a   :  { %2718 = vmatmul.mubr.msk.f32.vlgmr.msra.gmra.mxu1 %vm286_vm3, %v1621_v37 }
 0x92b   :  { %2728 = vmatpush3.msra.mxu1 %v1791_v26  ;;  %2731 = vmatprep.mubr.msk.f32.mxu1 %vm2962_vm0, %v2961_v0 }
 0x92c   :  { %2729 = vmatprep.subr.mxu1 %v2961_v0 }
 0x92d   :  { %2730 = vmatpush3.msra.mxu1 %v1789_v25 }
 0x92e   :  { %2732 = vmatmul.mubr.msk.f32.vlgmr.msra.gmra.mxu1 %vm198_vm1, %v2813_v22  ;;  %2734 = vmatprep.subr.mxu1 %v2961_v0 }
 0x92f   :  { %2736 = vmatprep.mubr.msk.f32.mxu1 %vm2962_vm0, %v2961_v0  ;;  %2735 = vmatpush3.msra.mxu1 %v1278_v39 }
 0x930   :  { %2746 = vmatprep.subr.mxu1 %v2961_v0 }
 0x963   :  { %v1786_v43 = vpop.xlane.xlu1 %1785 }
 0x964   :  { %2818 = vrcp.f32 %v1786_v43 }
 0x967   :  { %v2035_v49 = vpop.permute.xlu1 %2034 }
 0x971   :  { %v2819_v46 = vpop.eup %2818 }
 0x99c   :  { %v2032_v56 = vpop.xlane.xlu1 %2031 }
 0x9a0   :  { %v2281_v5 = vpop.permute.xlu1 %2280 }
 0x9c1   :  { %v2266_v40 = vpop.f32.mrf.mxu0 }
 0x9c2   :  { %v2270_v41 = vsel %vm198_vm1, %v2266_v40, -inf }
 0x9c3   :  { %2271 = vmax.xlane.f32.xlu0 %v2270_v41  ;;  %v2764_v42 = vpop.f32.mrf.mxu0 }
 0x9d9   :  { %2282 = vrot.lane.b32.xlu0 %v3196_v50, %s2969_s15  ;;  %v1279_v50 = vld [vmem:[#allocation10 + $0x30] sm:$0xff] }
 0x9ea   :  { %v1691_v44 = vpop.f32.mrf.mxu1 }
 0x9eb   :  { %v1695_v58 = vadd.f32 %v2486_v57, %v1691_v44 }
 0x9ec   :  { %v2719_v45 = vpop.f32.mrf.mxu1 }
 0x9ee   :  { %v1863_v47 = vpop.f32.mrf.mxu1 }
 0x9ef   :  { %v1867_v4 = vmul.f32 %v2819_v46, %v1863_v47 }
 0x9f0   :  { %v2733_v48 = vpop.f32.mrf.mxu1 }
 0x9f1   :  { %2737 = vmatmul.mubr.msk.f32.vlgmr.msra.gmra.mxu1 %vm286_vm3, %v1867_v4 }
 0x9f2   :  { %2747 = vmatpush3.msra.mxu1 %v2037_v6  ;;  %2750 = vmatprep.mubr.msk.f32.mxu1 %vm2962_vm0, %v2961_v0 }
 0x9f3   :  { %2748 = vmatprep.subr.mxu1 %v2961_v0 }
 0x9f4   :  { %2749 = vmatpush3.msra.mxu1 %v2035_v49 }
 0x9f5   :  { %2751 = vmatmul.mubr.msk.f32.vlgmr.msra.gmra.mxu1 %vm198_vm1, %v2815_v33  ;;  %2753 = vmatprep.subr.mxu1 %v2961_v0 }
 0x9f6   :  { %2755 = vmatprep.mubr.msk.f32.mxu1 %vm2962_vm0, %v2961_v0  ;;  %2754 = vmatpush3.msra.mxu1 %v1279_v50 }
 0x9f7   :  { %2765 = vmatprep.subr.mxu1 %v2961_v0 }
 0xa4c   :  { %v2272_v51 = vpop.xlane.xlu0 %2271 }
 0xa4d   :  { %v2273_v52 = vsub.f32 %v2266_v40, %v2272_v51 }
 0xa4f   :  { %v2274_v53 = vmul.f32 1.442695, %v2273_v52 }
 0xa50   :  { %v2283_v3 = vpop.permute.xlu0 %2282 }
 0xa51   :  { %2820 = vpow2.f32 %v2274_v53 }
 0xa52   :  { %2822 = vrcp.f32 %v2032_v56 }
 0xa5e   :  { %v2821_v54 = vpop.eup %2820 }
 0xa5f   :  { %v2276_v55 = vsel %vm198_vm1, %v2821_v54, 0.0  ;;  %v2823_v62 = vpop.eup %2822 }
 0xa60   :  { %2277 = vadd.xlane.f32.xlu1 %v2276_v55 }
 0xab1   :  { %v1937_v59 = vpop.f32.mrf.mxu1 }
 0xab2   :  { %v1941_v60 = vadd.f32 %v1937_v59, %v1695_v58 }
 0xab3   :  { %v2738_v61 = vpop.f32.mrf.mxu1 }
 0xab5   :  { %v2109_v63 = vpop.f32.mrf.mxu1 }
 0xab6   :  { %v2113_v1 = vmul.f32 %v2823_v62, %v2109_v63 }
 0xab7   :  { %v2752_v2 = vpop.f32.mrf.mxu1 }
 0xab8   :  { %2756 = vmatmul.mubr.msk.f32.vlgmr.msra.gmra.mxu1 %vm286_vm3, %v2113_v1 }
 0xab9   :  { %2766 = vmatpush3.msra.mxu1 %v2283_v3  ;;  %2769 = vmatprep.mubr.msk.f32.mxu1 %vm2962_vm0, %v2961_v0 }
 0xaba   :  { %2767 = vmatprep.subr.mxu1 %v2961_v0 }
 0xabb   :  { %2768 = vmatpush3.msra.mxu1 %v2281_v5 }
 0xabc   :  { %2770 = vmatmul.mubr.msk.f32.vlgmr.msra.gmra.mxu1 %vm198_vm1, %v2821_v54  ;;  %2772 = vmatprep.subr.mxu1 %v2961_v0 }
 0xabd   :  { %2774 = vmatprep.mubr.msk.f32.mxu1 %vm2962_vm0, %v2961_v0  ;;  %2773 = vmatpush3.msra.mxu1 %v1280_v7 }
 0xae9   :  { %v2278_v8 = vpop.xlane.xlu1 %2277 }
 0xaea   :  { %2824 = vrcp.f32 %v2278_v8 }
 0xaf7   :  { %v2825_v12 = vpop.eup %2824 }
 0xb78   :  { %v2183_v9 = vpop.f32.mrf.mxu1 }
 0xb79   :  { %v2187_v10 = vadd.f32 %v2183_v9, %v1941_v60 }
 0xb7a   :  { %v2757_v11 = vpop.f32.mrf.mxu1 }
 0xb7c   :  { %v2355_v13 = vpop.f32.mrf.mxu1 }
 0xb7d   :  { %v2359_v14 = vmul.f32 %v2825_v12, %v2355_v13 }
 0xb7e   :  { %v2771_v15 = vpop.f32.mrf.mxu1 }
 0xb7f   :  { %2775 = vmatmul.mubr.msk.f32.vlgmr.msra.gmra.mxu1 %vm286_vm3, %v2359_v14 }
 0xc3f   :  { %v2429_v16 = vpop.f32.mrf.mxu1 }
 0xc40   :  { %v2433_v17 = vadd.f32 %v2429_v16, %v2187_v10 }
 0xc41   :  { %v2776_v18 = vpop.f32.mrf.mxu1 }
 0xc42   :  { %2434 = vst.msk [vmem:[#allocation11] sm:$0xff] %vm118_vm2, %v2433_v17 }
 0xc43   :  { %2937 = shalt.err (!%p2934_p1)
}
 0xc44   :  { %2444 = dma.vmem_to_hbm [thread:$0]  %s2442_s21, 128, %s3317_s8, [#allocation4]  }
 0xc45   :  { %2952 = dma.done.wait [#allocation4], 128  }
 0xc46   :  { %2953 = vsyncadd [#allocation4], 4294967168 }
 0xc47   :  { %2448 = vsyncpa [#allocation3], 1 }
 0xc48   :  { %2449 = vsyncpa [#allocation6], 1 }
 0xc49   :  { %2450 = vsyncpa [#allocation9], 1 }
 0xc4a   :  { %2451 = vsyncpa [#allocation4], 1 }

</bundles_post_ra>
